<compile_context>
chip_gen: v6e
topology: v6e:2x2x1
jax: 0.10.0
libtpu: 0.0.40
codegen_flags: <defaults>
</compile_context>

<pallas_src>
import functools

import jax
import jax.numpy as jnp
from jax.experimental import pallas as pl
from jax.experimental.pallas import tpu as pltpu


def _round_up(a: int, b: int) -> int:
    return (a + b - 1) // b * b


def _vmem_limit_bytes() -> int:
    """Per-generation VMEM limit: ~75% of physical, capped; safe 48 MiB fallback."""
    cap = 0
    try:
        get_info = getattr(pltpu, "get_tpu_info", None)
        if get_info is not None:
            cap = int(getattr(get_info(), "vmem_capacity_bytes", 0) or 0)
    except Exception:
        cap = 0
    if cap <= 0:
        return 48 * 1024 * 1024  # valid on every generation (v7x has 64 MiB per TC)
    return max(32 * 1024 * 1024, min(cap * 3 // 4, 110 * 1024 * 1024))


def _pick_tm(M: int, D: int, budget_bytes: int = 8 * 1024 * 1024) -> int:
    """Row-tile size scaled with D (live bytes/row ~ 28*D with double-buffered streams);
    ensure >= 2 row tiles (v7x megacore) when there is enough work."""
    tm = budget_bytes // max(D * 28, 1)
    tm = max(8, min(tm, 8192))
    tm = _round_up(min(tm, max(M, 1)), 8)
    if M > 8 and _round_up(M, tm) // tm < 2:
        tm = _round_up(pl.cdiv(M, 2), 8)  # give both TensorCores a tile
    return tm


# ----------------------------- fused Pallas kernel ----------------------------

def _fused_decoder_kernel(x_ref, enc_ref, wx_ref, we_ref, b_ref, alpha_ref, gamma_ref,
                          o_ref, *, eps):
    """Grid = (row_tiles,). Per tile: run all layers, then the LayerNorm epilogue.

    Per layer:  x <- x + relu(x @ Wx[l] + enc @ We[l] + b[l])   (f32 accumulation)
    Weights / biases are resident VMEM blocks; the layer loop is unrolled at trace
    time (static trip count, static ref slices — no per-layer concat, no scratch).
    """
    D = x_ref.shape[-1]
    num_layers = wx_ref.shape[0]
    mxu_dtype = wx_ref.dtype

    x = x_ref[...].astype(jnp.float32)   # (tm, D) running activation, f32
    enc = enc_ref[...]                   # (tm, D) bf16, feeds the MXU only

    for l in range(num_layers):
        h = jnp.dot(x.astype(mxu_dtype), wx_ref[l], preferred_element_type=jnp.float32)
        h = h + jnp.dot(enc, we_ref[l], preferred_element_type=jnp.float32)
        h = jnp.maximum(h + b_ref[l], 0.0)   # bias + relu in f32
        x = x + h                            # residual in f32

    # Layernormalization: mean / unbiased std (torch.std default, ddof=1), exact divide.
    mean = jnp.mean(x, axis=-1, keepdims=True)
    diff = x - mean
    var = jnp.sum(diff * diff, axis=-1, keepdims=True) * (1.0 / (D - 1))
    std = jnp.sqrt(var)
    xn = diff / (std + eps)
    o_ref[...] = (alpha_ref[...] * xn + gamma_ref[...]).astype(o_ref.dtype)


# ----------------------------- wrapper -----------------------------------------

def decoder_forward(x, enc_out, wx_stack, we_stack, b_stack, alpha, gamma,
                    tgt_mask=None, src_mask=None, eps=1e-5,
                    mxu_dtype=jnp.bfloat16):
    """Mirrors Decoder.forward: L layers then Layernormalization, fused in one kernel.

    Note: matmul inputs are cast to `mxu_dtype` (bf16 by default) for the MXU; pass
    jnp.float32 for exact fidelity to an f32 PyTorch Decoder at the cost of bandwidth.
    """
    # TODO(synk): tgt_mask / src_mask unused (layer internals unspecified by the module).
    B, S, D = x.shape
    L = int(wx_stack.shape[0])
    assert L >= 1
    assert D >= 2, "unbiased std (torch.std default) divides by D-1"
    M = B * S

    # TODO(synk): for production shapes make D a multiple of 128 (lane-dense stores /
    # full MXU columns); the D=32 test shape necessarily uses masked partial stores.
    wx = wx_stack.astype(mxu_dtype)                       # (L, D, D)  resident in VMEM
    we = we_stack.astype(mxu_dtype)                       # (L, D, D)  resident in VMEM
    b = b_stack.reshape(L, 1, D).astype(jnp.float32)      # (L, 1, D)  resident in VMEM
    a2 = jnp.asarray(alpha, jnp.float32).reshape(1, 1)    # scalar LN params as (1,1)
    g2 = jnp.asarray(gamma, jnp.float32).reshape(1, 1)

    x2 = x.reshape(M, D).astype(jnp.float32)              # lane-dense activation slab
    e2 = enc_out.reshape(M, D).astype(mxu_dtype)          # enc only feeds the MXU -> bf16

    tm = _pick_tm(M, D)
    M_pad = _round_up(M, tm)
    if M_pad != M:
        x2 = jnp.pad(x2, ((0, M_pad - M), (0, 0)))
        e2 = jnp.pad(e2, ((0, M_pad - M), (0, 0)))

    grid = (M_pad // tm,)

    out = pl.pallas_call(
        functools.partial(_fused_decoder_kernel, eps=eps),
        out_shape=jax.ShapeDtypeStruct((M_pad, D), jnp.float32),
        grid_spec=pltpu.PrefetchScalarGridSpec(
            num_scalar_prefetch=0,
            grid=grid,
            in_specs=[
                pl.BlockSpec((tm, D), lambda m: (m, 0)),        # x tile (streams per m)
                pl.BlockSpec((tm, D), lambda m: (m, 0)),        # enc tile (streams per m)
                pl.BlockSpec((L, D, D), lambda m: (0, 0, 0)),   # Wx stack (resident, 1 DMA)
                pl.BlockSpec((L, D, D), lambda m: (0, 0, 0)),   # We stack (resident, 1 DMA)
                pl.BlockSpec((L, 1, D), lambda m: (0, 0, 0)),   # bias stack (resident)
                pl.BlockSpec((1, 1), lambda m: (0, 0)),         # alpha
                pl.BlockSpec((1, 1), lambda m: (0, 0)),         # gamma
            ],
            out_specs=pl.BlockSpec((tm, D), lambda m: (m, 0)),  # written once per tile
        ),
        compiler_params=pltpu.CompilerParams(
            dimension_semantics=("parallel",),          # row tiles shard across TCs
            vmem_limit_bytes=_vmem_limit_bytes(),       # per-generation VMEM budget
        ),
    )(x2, e2, wx, we, b, a2, g2)

    return out[:M].reshape(B, S, D)


# ----------------------------- reference (pure JAX) -----------------------------

def _reference_forward(x, enc_out, wx_stack, we_stack, b_stack, alpha, gamma,
                       eps=1e-5, mxu_dtype=jnp.bfloat16):
    L = wx_stack.shape[0]
    enc_bf = enc_out.astype(mxu_dtype)
    for i in range(L):
        h = jnp.einsum("bsd,dk->bsk", x.astype(mxu_dtype), wx_stack[i].astype(mxu_dtype),
                       preferred_element_type=jnp.float32)
        h = h + jnp.einsum("bsd,dk->bsk", enc_bf, we_stack[i].astype(mxu_dtype),
                           preferred_element_type=jnp.float32)
        x = x + jnp.maximum(h + b_stack[i], 0.0)
    mean = jnp.mean(x, axis=-1, keepdims=True)
    diff = x - mean
    std = jnp.sqrt(jnp.sum(diff * diff, axis=-1, keepdims=True) / (x.shape[-1] - 1))
    xn = diff / (std + eps)
    return alpha * xn + gamma


# ----------------------------- main ---------------------------------------------

if __name__ == "__main__":
    B, S, D = 2, 8, 32
    NUM_LAYERS = 2

    key = jax.random.PRNGKey(0)
    k_x, k_e, *k_layers = jax.random.split(key, 2 + 3 * NUM_LAYERS)

    x = jax.random.normal(k_x, (B, S, D), dtype=jnp.float32)
    enc_out = jax.random.normal(k_e, (B, S, D), dtype=jnp.float32)

    # Deterministic synthetic layer parameters, stacked along the layer axis.
    wx_list, we_list, b_list = [], [], []
    for i in range(NUM_LAYERS):
        kw, kv, kb = k_layers[3 * i], k_layers[3 * i + 1], k_layers[3 * i + 2]
        wx_list.append(0.05 * jax.random.normal(kw, (D, D), dtype=jnp.float32))
        we_list.append(0.05 * jax.random.normal(kv, (D, D), dtype=jnp.float32))
        b_list.append(0.05 * jax.random.normal(kb, (D,), dtype=jnp.float32))
    wx_stack = jnp.stack(wx_list)      # (L, D, D)
    we_stack = jnp.stack(we_list)      # (L, D, D)
    b_stack = jnp.stack(b_list)        # (L, D)

    # Layernormalization params (as in __init__): alpha = ones(1), gamma = zeros(1).
    alpha = jnp.ones((1,), dtype=jnp.float32)
    gamma = jnp.zeros((1,), dtype=jnp.float32)

    out = decoder_forward(x, enc_out, wx_stack, we_stack, b_stack, alpha, gamma)
    out = jax.block_until_ready(out)

    ref = _reference_forward(x, enc_out, wx_stack, we_stack, b_stack, alpha, gamma)
    assert out.shape == (B, S, D)
    err = float(jnp.max(jnp.abs(out - ref)))
    assert err < 5e-3, f"Pallas output mismatch vs JAX reference (max abs err = {err})"

    print("KERNEL_OK")
</pallas_src>

<mosaic_0001>
module attributes {stable_mosaic.version = 11 : i64} {
  func.func @_fused_decoder_kernel(%arg0: i32, %arg1: memref<8x32xf32, #tpu.memory_space<vmem>>, %arg2: memref<8x32xbf16, #tpu.memory_space<vmem>>, %arg3: memref<2x32x32xbf16, #tpu.memory_space<vmem>>, %arg4: memref<2x32x32xbf16, #tpu.memory_space<vmem>>, %arg5: memref<2x1x32xf32, #tpu.memory_space<vmem>>, %arg6: memref<1x1xf32, #tpu.memory_space<vmem>>, %arg7: memref<1x1xf32, #tpu.memory_space<vmem>>, %arg8: memref<8x32xf32, #tpu.memory_space<vmem>>) attributes {dimension_semantics = [#tpu.dimension_semantics<parallel>], iteration_bounds = array<i64: 2>, scalar_prefetch = 0 : i64, scratch_operands = 0 : i64, tpu.core_type = #tpu.core_type<tc>, window_params = [{transform_indices = @transform_0, window_bounds = array<i64: 8, 32>}, {transform_indices = @transform_1, window_bounds = array<i64: 8, 32>}, {pipeline_mode = #tpu.pipeline_mode<synchronous>, transform_indices = @transform_2, window_bounds = array<i64: 2, 32, 32>}, {pipeline_mode = #tpu.pipeline_mode<synchronous>, transform_indices = @transform_3, window_bounds = array<i64: 2, 32, 32>}, {pipeline_mode = #tpu.pipeline_mode<synchronous>, transform_indices = @transform_4, window_bounds = array<i64: 2, 1, 32>}, {pipeline_mode = #tpu.pipeline_mode<synchronous>, transform_indices = @transform_5, window_bounds = array<i64: 1, 1>}, {pipeline_mode = #tpu.pipeline_mode<synchronous>, transform_indices = @transform_6, window_bounds = array<i64: 1, 1>}, {transform_indices = @transform_7, window_bounds = array<i64: 8, 32>}]} {
    %c0 = arith.constant 0 : index
    %c0_0 = arith.constant 0 : index
    %0 = vector.load %arg1[%c0, %c0_0] : memref<8x32xf32, #tpu.memory_space<vmem>>, vector<8x32xf32>
    %c0_1 = arith.constant 0 : index
    %c0_2 = arith.constant 0 : index
    %1 = vector.load %arg2[%c0_1, %c0_2] : memref<8x32xbf16, #tpu.memory_space<vmem>>, vector<8x32xbf16>
    %2 = arith.truncf %0 : vector<8x32xf32> to vector<8x32xbf16>
    %c0_3 = arith.constant 0 : index
    %c0_4 = arith.constant 0 : index
    %c0_5 = arith.constant 0 : index
    %3 = vector.load %arg3[%c0_3, %c0_4, %c0_5] : memref<2x32x32xbf16, #tpu.memory_space<vmem>>, vector<1x32x32xbf16>
    %4 = vector.shape_cast %3 : vector<1x32x32xbf16> to vector<32x32xbf16>
    %cst = arith.constant dense<0.000000e+00> : vector<8x32xf32>
    %5 = tpu.matmul %2, %4, %cst {dimension_numbers = #tpu.dot_dimension_numbers<[1], [0], [0], [1], [0, 0, 1, 1], [], []>} : vector<8x32xbf16>, vector<32x32xbf16>, vector<8x32xf32> -> vector<8x32xf32>
    %c0_6 = arith.constant 0 : index
    %c0_7 = arith.constant 0 : index
    %c0_8 = arith.constant 0 : index
    %6 = vector.load %arg4[%c0_6, %c0_7, %c0_8] : memref<2x32x32xbf16, #tpu.memory_space<vmem>>, vector<1x32x32xbf16>
    %7 = vector.shape_cast %6 : vector<1x32x32xbf16> to vector<32x32xbf16>
    %cst_9 = arith.constant dense<0.000000e+00> : vector<8x32xf32>
    %8 = tpu.matmul %1, %7, %cst_9 {dimension_numbers = #tpu.dot_dimension_numbers<[1], [0], [0], [1], [0, 0, 1, 1], [], []>} : vector<8x32xbf16>, vector<32x32xbf16>, vector<8x32xf32> -> vector<8x32xf32>
    %9 = arith.addf %5, %8 : vector<8x32xf32>
    %c0_10 = arith.constant 0 : index
    %c0_11 = arith.constant 0 : index
    %c0_12 = arith.constant 0 : index
    %10 = vector.load %arg5[%c0_10, %c0_11, %c0_12] : memref<2x1x32xf32, #tpu.memory_space<vmem>>, vector<1x1x32xf32>
    %11 = vector.shape_cast %10 : vector<1x1x32xf32> to vector<1x32xf32>
    %12 = vector.broadcast %11 : vector<1x32xf32> to vector<8x32xf32>
    %13 = arith.addf %9, %12 : vector<8x32xf32>
    %cst_13 = arith.constant 0.000000e+00 : f32
    %14 = vector.broadcast %cst_13 : f32 to vector<8x32xf32>
    %15 = arith.maximumf %13, %14 : vector<8x32xf32>
    %16 = arith.addf %0, %15 : vector<8x32xf32>
    %17 = arith.truncf %16 : vector<8x32xf32> to vector<8x32xbf16>
    %c1 = arith.constant 1 : index
    %c0_14 = arith.constant 0 : index
    %c0_15 = arith.constant 0 : index
    %18 = vector.load %arg3[%c1, %c0_14, %c0_15] : memref<2x32x32xbf16, #tpu.memory_space<vmem>>, vector<1x32x32xbf16>
    %19 = vector.shape_cast %18 : vector<1x32x32xbf16> to vector<32x32xbf16>
    %cst_16 = arith.constant dense<0.000000e+00> : vector<8x32xf32>
    %20 = tpu.matmul %17, %19, %cst_16 {dimension_numbers = #tpu.dot_dimension_numbers<[1], [0], [0], [1], [0, 0, 1, 1], [], []>} : vector<8x32xbf16>, vector<32x32xbf16>, vector<8x32xf32> -> vector<8x32xf32>
    %c1_17 = arith.constant 1 : index
    %c0_18 = arith.constant 0 : index
    %c0_19 = arith.constant 0 : index
    %21 = vector.load %arg4[%c1_17, %c0_18, %c0_19] : memref<2x32x32xbf16, #tpu.memory_space<vmem>>, vector<1x32x32xbf16>
    %22 = vector.shape_cast %21 : vector<1x32x32xbf16> to vector<32x32xbf16>
    %cst_20 = arith.constant dense<0.000000e+00> : vector<8x32xf32>
    %23 = tpu.matmul %1, %22, %cst_20 {dimension_numbers = #tpu.dot_dimension_numbers<[1], [0], [0], [1], [0, 0, 1, 1], [], []>} : vector<8x32xbf16>, vector<32x32xbf16>, vector<8x32xf32> -> vector<8x32xf32>
    %24 = arith.addf %20, %23 : vector<8x32xf32>
    %c1_21 = arith.constant 1 : index
    %c0_22 = arith.constant 0 : index
    %c0_23 = arith.constant 0 : index
    %25 = vector.load %arg5[%c1_21, %c0_22, %c0_23] : memref<2x1x32xf32, #tpu.memory_space<vmem>>, vector<1x1x32xf32>
    %26 = vector.shape_cast %25 : vector<1x1x32xf32> to vector<1x32xf32>
    %27 = vector.broadcast %26 : vector<1x32xf32> to vector<8x32xf32>
    %28 = arith.addf %24, %27 : vector<8x32xf32>
    %cst_24 = arith.constant 0.000000e+00 : f32
    %29 = vector.broadcast %cst_24 : f32 to vector<8x32xf32>
    %30 = arith.maximumf %28, %29 : vector<8x32xf32>
    %31 = arith.addf %16, %30 : vector<8x32xf32>
    %cst_25 = arith.constant dense<0.000000e+00> : vector<8xf32>
    %32 = vector.multi_reduction <add>, %31, %cst_25 [1] : vector<8x32xf32> to vector<8xf32>
    %33 = vector.shape_cast %32 : vector<8xf32> to vector<8x1xf32>
    %cst_26 = arith.constant 3.200000e+01 : f32
    %34 = vector.broadcast %cst_26 : f32 to vector<8x1xf32>
    %35 = arith.divf %33, %34 : vector<8x1xf32>
    %36 = vector.broadcast %35 : vector<8x1xf32> to vector<8x32xf32>
    %37 = arith.subf %31, %36 : vector<8x32xf32>
    %38 = arith.mulf %37, %37 : vector<8x32xf32>
    %cst_27 = arith.constant dense<0.000000e+00> : vector<8xf32>
    %39 = vector.multi_reduction <add>, %38, %cst_27 [1] : vector<8x32xf32> to vector<8xf32>
    %40 = vector.shape_cast %39 : vector<8xf32> to vector<8x1xf32>
    %cst_28 = arith.constant 0.0322580636 : f32
    %41 = vector.broadcast %cst_28 : f32 to vector<8x1xf32>
    %42 = arith.mulf %40, %41 : vector<8x1xf32>
    %43 = math.sqrt %42 : vector<8x1xf32>
    %cst_29 = arith.constant 9.99999974E-6 : f32
    %44 = vector.broadcast %cst_29 : f32 to vector<8x1xf32>
    %45 = arith.addf %43, %44 : vector<8x1xf32>
    %46 = vector.broadcast %45 : vector<8x1xf32> to vector<8x32xf32>
    %47 = arith.divf %37, %46 : vector<8x32xf32>
    %c0_30 = arith.constant 0 : index
    %c0_31 = arith.constant 0 : index
    %48 = vector.load %arg6[%c0_30, %c0_31] : memref<1x1xf32, #tpu.memory_space<vmem>>, vector<1x1xf32>
    %49 = vector.broadcast %48 : vector<1x1xf32> to vector<8x32xf32>
    %50 = arith.mulf %49, %47 : vector<8x32xf32>
    %c0_32 = arith.constant 0 : index
    %c0_33 = arith.constant 0 : index
    %51 = vector.load %arg7[%c0_32, %c0_33] : memref<1x1xf32, #tpu.memory_space<vmem>>, vector<1x1xf32>
    %52 = vector.broadcast %51 : vector<1x1xf32> to vector<8x32xf32>
    %53 = arith.addf %50, %52 : vector<8x32xf32>
    %c0_34 = arith.constant 0 : index
    %c0_35 = arith.constant 0 : index
    %54 = vector.load %arg8[%c0_34, %c0_35] : memref<8x32xf32, #tpu.memory_space<vmem>>, vector<8x32xf32>
    tpu.vector_store %arg8[%c0_34, %c0_35], %53 {strides = array<i32>} : memref<8x32xf32, #tpu.memory_space<vmem>>, vector<8x32xf32>,
    return
  }
  func.func @transform_0(%arg0: i32) -> (i32, i32) {
    %c0_i32 = arith.constant 0 : i32
    %c0_i32_0 = arith.constant 0 : i32
    return %arg0, %c0_i32 : i32, i32
  }
  func.func @transform_1(%arg0: i32) -> (i32, i32) {
    %c0_i32 = arith.constant 0 : i32
    %c0_i32_0 = arith.constant 0 : i32
    return %arg0, %c0_i32 : i32, i32
  }
  func.func @transform_2(%arg0: i32) -> (i32, i32, i32) {
    %c0_i32 = arith.constant 0 : i32
    %c0_i32_0 = arith.constant 0 : i32
    %c0_i32_1 = arith.constant 0 : i32
    %c0_i32_2 = arith.constant 0 : i32
    return %c0_i32, %c0_i32_0, %c0_i32_1 : i32, i32, i32
  }
  func.func @transform_3(%arg0: i32) -> (i32, i32, i32) {
    %c0_i32 = arith.constant 0 : i32
    %c0_i32_0 = arith.constant 0 : i32
    %c0_i32_1 = arith.constant 0 : i32
    %c0_i32_2 = arith.constant 0 : i32
    return %c0_i32, %c0_i32_0, %c0_i32_1 : i32, i32, i32
  }
  func.func @transform_4(%arg0: i32) -> (i32, i32, i32) {
    %c0_i32 = arith.constant 0 : i32
    %c0_i32_0 = arith.constant 0 : i32
    %c0_i32_1 = arith.constant 0 : i32
    %c0_i32_2 = arith.constant 0 : i32
    return %c0_i32, %c0_i32_0, %c0_i32_1 : i32, i32, i32
  }
  func.func @transform_5(%arg0: i32) -> (i32, i32) {
    %c0_i32 = arith.constant 0 : i32
    %c0_i32_0 = arith.constant 0 : i32
    %c0_i32_1 = arith.constant 0 : i32
    return %c0_i32, %c0_i32_0 : i32, i32
  }
  func.func @transform_6(%arg0: i32) -> (i32, i32) {
    %c0_i32 = arith.constant 0 : i32
    %c0_i32_0 = arith.constant 0 : i32
    %c0_i32_1 = arith.constant 0 : i32
    return %c0_i32, %c0_i32_0 : i32, i32
  }
  func.func @transform_7(%arg0: i32) -> (i32, i32) {
    %c0_i32 = arith.constant 0 : i32
    %c0_i32_0 = arith.constant 0 : i32
    return %arg0, %c0_i32 : i32, i32
  }
}

</mosaic_0001>

<bundles_post_ra>
// kernel: tpu_custom_call.1
= control target key start
LH: loop header
LB: loop body
LE: loop exit
PB: predicated region body
PF: predicated region fallthrough
CT: control target
= control target key end

     0   :  { %s1451_s0 = inlined_call_operand.hbm [shape: f32[16,32], index: 0, kind: input, shape index: {}]   ;;  %s1452_s1 = inlined_call_operand.hbm [shape: bf16[16,32], index: 1, kind: input, shape index: {}]   ;;  %s1453_s2 = inlined_call_operand.hbm [shape: bf16[2,32,32], index: 2, kind: input, shape index: {}]   ;;  %s1454_s3 = inlined_call_operand.hbm [shape: bf16[2,32,32], index: 3, kind: input, shape index: {}]   ;;  %s1455_s4 = inlined_call_operand.vmem [shape: f32[2,1,32], index: 4, kind: input, shape index: {}]   ;;  %s1456_s5 = inlined_call_operand.<no memory space> [shape: f32[1,1], index: 5, kind: input, shape index: {}]   ;;  %s1457_s7 = inlined_call_operand.hbm [shape: f32[16,32], index: 7, kind: output, shape index: {}]   ;;  %s1458_s6 = inlined_call_operand.<no memory space> [shape: f32[1,1], index: 6, kind: input, shape index: {}]  }
   0x1   :  { %1463 = sst [smem:[#allocation18_spill]] %s1451_s0  ;;  %v12_v0 = vstv %s1456_s5  ;;  %v14_v1 = vstv %s1458_s6 }
   0x2   :  { %13 = vst [vmem:[#allocation2] sm:$0x1] %v12_v0  ;;  %15 = vst [vmem:[#allocation3] sm:$0x1] %v14_v1 }
   0x3   :  { %16 = vsyncpa [#allocation5], 0 }
   0x4   :  { %18 = vsyncpa [#allocation5 + $0x1], 0 }
   0x5   :  { %19 = vsyncpa [#allocation8], 0 }
   0x6   :  { %21 = vsyncpa [#allocation8 + $0x1], 0 }
   0x7   :  { %22 = vsyncpa [#allocation11], 0 }
   0x8   :  { %23 = vsyncpa [#allocation6], 0 }
   0x9   :  { %25 = vsyncpa [#allocation6 + $0x1], 0  ;;  %s1209_s28 = smov 0   ;;  %s1211_s29 = smov 0  }
   0xa   :  { %s1213_s30 = smov 0   ;;  %s1215_s5 = smov 0  }
   0xb LB: > { %s1230_s6 = sadd.s32 4294967295, %s1151_s5   ;;  %s796_s8 = sadd.s32 4294967294, %s1151_s5   ;;  %s1151_s5 = sphi %s1215_s5, %s1485_s5   ;;  %s1147_s30 = sphi %s1213_s30, %s1484_s30   ;;  %s1143_s29 = sphi %s1211_s29, %s1483_s29   ;;  %s1139_s28 = sphi %s1209_s28, %s1482_s28  }
   0xc   : > { %p51_p0 = scmp.ne.s32.totalorder %s1143_s29, %s1139_s28  ;;  %p1459_p1 = scmp.eq.s32.totalorder %s1230_s6, 0 }
   0xd   : > { %p212_p3 = scmp.eq.s32.totalorder %s796_s8, 1  ;;  %p797_p5 = scmp.ge.s32.totalorder %s1151_s5, 1 }
   0xe   : > { %p1239_p4 = por %p1459_p1, %p51_p0  ;;  %p219_p7 = scmp.lt.s32.totalorder %s1151_s5, 3 }
   0xf   : > { %p1244_p6 = por %p212_p3, %p51_p0  ;;  %s1153_s12 = smov [#allocation9]  }
  0x10   : > { %s1464_s9 = scalar_select %p1239_p4, 1, 0 }
  0x11   : > { %s1465_s10 = scalar_select %p1244_p6, 1, 0 }
  0x12   : > { %p1249_p8 = pnand %p797_p5, %p219_p7  ;;  %s231_s13 = sshll.u32 %s1153_s12, 4  ;;  %s232_s13 = int_to_ptr.vmem [resolvable:$true] %s231_s13 }
  0x13   : > { %s1154_s15 = smov [#allocation10]   ;;  %s978_s17 = scalar_lea.vmem %s232_s13, 512 }
  0x14   : > { %s1466_s11 = scalar_select %p1249_p8, 1, 0 }
  0x15   : > { %p890_p9 = pneg %p1249_p8  ;;  %s244_s16 = sshll.u32 %s1154_s15, 4  ;;  %s245_s16 = int_to_ptr.vmem [resolvable:$true] %s244_s16 }
  0x16   : > { %p979_p13 = scmp.ne.s32.totalorder %s232_s13, %s978_s17  ;;  %p986_p5 = scmp.lt.s32.totalorder %s232_s13, %s232_s13 }
  0x17   : > { %p1258_p11 = pnand %p890_p9, %p1459_p1  ;;  %p987_p7 = scmp.lt.s32.totalorder %s978_s17, %s978_s17 }
  0x19   : > { %p969_p12 = pneg %p1258_p11  ;;  %p988_p10 = por %p987_p7, %p986_p5 }
  0x1b   : > { %p981_p0 = pnand %p979_p13, %p969_p12 }
  0x1d   : > { %p982_p3 = pneg %p981_p0 }
  0x1f   : > { %p989_p9 = pnand %p988_p10, %p982_p3 }
  0x21   : > { %992 = shalt.err (!%p989_p9)
}
  0x22   : > { %s1155_s18 = smov 64   ;;  %s1156_s19 = smov 4  }
  0x23   : > { %893 = dma.hbm_to_vmem [thread:$0]  (!%p1258_p11), %s1453_s2, 512, %s232_s13, [#allocation8], %s1155_s18, %s1155_s18, %s1156_s19  }
  0x24   : > { %s1004_s22 = scalar_lea.vmem %s245_s16, 512  ;;  %p1012_p2 = scmp.lt.s32.totalorder %s245_s16, %s245_s16 }
  0x25   : > { %p1005_p1 = scmp.ne.s32.totalorder %s245_s16, %s1004_s22  ;;  %p1013_p6 = scmp.lt.s32.totalorder %s1004_s22, %s1004_s22 }
  0x27   : > { %p1007_p13 = pnand %p1005_p1, %p969_p12  ;;  %p1014_p5 = por %p1013_p6, %p1012_p2 }
  0x29   : > { %p1008_p0 = pneg %p1007_p13 }
  0x2b   : > { %p1015_p10 = pnand %p1014_p5, %p1008_p0 }
  0x2d   : > { %1018 = shalt.err (!%p1015_p10)
}
  0x2e   : > { %896 = dma.hbm_to_vmem [thread:$0]  (!%p1258_p11), %s1454_s3, 512, %s245_s16, [#allocation11], %s1155_s18, %s1155_s18, %s1156_s19  }
  0x2f   : > { %s1281_s25 = sadd.s32 1, %s1151_s5   ;;  %s38_s26 = sadd.s32 1, %s1147_s30 }
  0x30   : > { %s35_s27 = ssub.s32 %s1151_s5, %s1281_s25  ;;  %p45_p1 = scmp.ne.s32.totalorder %s1147_s30, %s1143_s29 }
  0x31   : > { %p36_p2 = scmp.eq.s32.totalorder %s35_s27, 0  ;;  %p46_p6 = scmp.eq.s32.totalorder %s1151_s5, 0 }
  0x32   : > { %p1468_p12 = scmp.eq.s32.totalorder %s1230_s6, 1  ;;  %p910_p7 = scmp.lt.s32.totalorder %s1151_s5, 2 }
  0x33   : > { %s1297_s12 = scalar_select %p36_p2, %s1147_s30, %s38_s26  }
  0x34   : > { %p1291_p3 = por %p1468_p12, %p45_p1  ;;  %p47_p9 = por %p46_p6, %p45_p1 }
  0x35   : > { %s1300_s13 = sand.u32 1, %s1147_s30   ;;  %s802_s15 = sshll.u32 %s1151_s5, 7 }
  0x36   : > { %s1469_s8 = scalar_select %p1291_p3, 1, 0 }
  0x37   : > { %s801_s14 = sshll.u32 %s1300_s13, 3  ;;  %s1470_s0 = sld [smem:[#allocation18_spill]] }
  0x38   : > { %s271_s19 = scalar_lea.vmem [#allocation4], %s801_s14  ;;  %p1311_p11 = pnand %p910_p7, %p47_p9 }
  0x39   : > { %s278_s20 = sshll.u32 %s271_s19, 4  ;;  %s803_s23 = sshll.u32 %s1300_s13, 2  ;;  %s1309_s20 = int_to_ptr.vmem [resolvable:$true] %s278_s20 }
  0x3a   : > { %s268_s24 = scalar_lea.sflag [#allocation5], %s1300_s13  ;;  %p1021_p0 = pneg %p1311_p11 }
  0x3d   : > { %s1307_s18 = scalar_lea.hbm %s1470_s0, %s802_s15  ;;  %s1024_s15 = scalar_lea.hbm %s1470_s0, 256 }
  0x3e   : > { %s1019_s26 = scalar_lea.hbm %s1307_s18, 128  ;;  %p1025_p1 = scmp.lt.s32.totalorder %s1307_s18, %s1470_s0 }
  0x3f   : > { %p1020_p13 = scmp.ne.s32.totalorder %s1307_s18, %s1019_s26  ;;  %p1026_p2 = scmp.lt.s32.totalorder %s1024_s15, %s1019_s26 }
  0x41   : > { %p1022_p5 = pnand %p1021_p0, %p1020_p13  ;;  %p1027_p6 = por %p1026_p2, %p1025_p1 }
  0x43   : > { %p1023_p10 = pneg %p1022_p5 }
  0x45   : > { %p1028_p12 = pnand %p1027_p6, %p1023_p10 }
  0x47   : > { %1031 = shalt.err (!%p1028_p12)
}
  0x48   : > { %s1032_s19 = scalar_lea.vmem %s1309_s20, 128  ;;  %s1157_s27 = smov [#allocation4]  }
  0x49   : > { %p1033_p7 = scmp.ne.s32.totalorder %s1309_s20, %s1032_s19  ;;  %s1037_s14 = sshll.u32 %s1157_s27, 4  ;;  %s1038_s14 = int_to_ptr.vmem [resolvable:$false] %s1037_s14 }
  0x4a   : > { %s1039_s22 = scalar_lea.vmem %s1038_s14, 256  ;;  %p1040_p5 = scmp.lt.s32.totalorder %s1309_s20, %s1038_s14 }
  0x4b   : > { %p1035_p9 = pnand %p1033_p7, %p1021_p0  ;;  %p1041_p3 = scmp.lt.s32.totalorder %s1039_s22, %s1032_s19 }
  0x4d   : > { %p1036_p13 = pneg %p1035_p9  ;;  %p1042_p4 = por %p1041_p3, %p1040_p5 }
  0x4f   : > { %p1043_p1 = pnand %p1042_p4, %p1036_p13 }
  0x51   : > { %1046 = shalt.err (!%p1043_p1)
}
  0x52   : > { %900 = dma.hbm_to_vmem [thread:$0]  (!%p1311_p11), %s1307_s18, 128, %s1309_s20, %s268_s24  }
  0x53   : > { %s804_s26 = sshll.u32 %s1151_s5, 6  ;;  %s289_s22 = scalar_lea.vmem [#allocation7], %s803_s23 }
  0x54   : > { %s1346_s17 = scalar_lea.hbm %s1452_s1, %s804_s26  ;;  %s296_s19 = sshll.u32 %s289_s22, 4  ;;  %s297_s19 = int_to_ptr.vmem [resolvable:$true] %s296_s19 }
  0x55   : > { %s1472_s27 = sand.u32 1, %s1151_s5   ;;  %s1047_s0 = scalar_lea.hbm %s1346_s17, 64 }
  0x56   : > { %s286_s14 = scalar_lea.sflag [#allocation8], %s1472_s27  ;;  %p1048_p4 = scmp.ne.s32.totalorder %s1346_s17, %s1047_s0 }
  0x57   : > { %s1052_s24 = scalar_lea.hbm %s1452_s1, 128  ;;  %p1053_p2 = scmp.lt.s32.totalorder %s1346_s17, %s1452_s1 }
  0x58   : > { %p1050_p3 = pnand %p1048_p4, %p1021_p0  ;;  %p1054_p6 = scmp.lt.s32.totalorder %s1052_s24, %s1047_s0 }
  0x5a   : > { %p1051_p10 = pneg %p1050_p3  ;;  %p1055_p12 = por %p1054_p6, %p1053_p2 }
  0x5c   : > { %p1056_p7 = pnand %p1055_p12, %p1051_p10 }
  0x5e   : > { %1059 = shalt.err (!%p1056_p7)
}
  0x5f   : > { %s1060_s23 = scalar_lea.vmem %s297_s19, 64  ;;  %s1158_s15 = smov [#allocation7]  }
  0x60   : > { %p1061_p9 = scmp.ne.s32.totalorder %s297_s19, %s1060_s23  ;;  %s1065_s16 = sshll.u32 %s1158_s15, 4  ;;  %s1066_s16 = int_to_ptr.vmem [resolvable:$false] %s1065_s16 }
  0x61   : > { %s1067_s22 = scalar_lea.vmem %s1066_s16, 128  ;;  %p1068_p1 = scmp.lt.s32.totalorder %s297_s19, %s1066_s16 }
  0x62   : > { %p1063_p13 = pnand %p1061_p9, %p1021_p0  ;;  %p1069_p4 = scmp.lt.s32.totalorder %s1067_s22, %s1060_s23 }
  0x64   : > { %p1064_p5 = pneg %p1063_p13  ;;  %p1070_p3 = por %p1069_p4, %p1068_p1 }
  0x66   : > { %p1071_p8 = pnand %p1070_p3, %p1064_p5 }
  0x68   : > { %1074 = shalt.err (!%p1071_p8)
}
  0x69   : > { %903 = dma.hbm_to_vmem [thread:$0]  (!%p1311_p11), %s1346_s17, 64, %s297_s19, %s286_s14  }
  0x6a   : > { %p1473_p10 = scmp.ne.s32.totalorder %s1466_s11, 0 }
  0x6b   : > { %s1373_s0 = sand.u32 (!%p1473_p10), 1, %s1143_s29   ;;  %p1474_p0 = scmp.ne.s32.totalorder (!%p1473_p10), %s1464_s9, 0 }
  0x6c   : > { %305 = sbr.rel (%p1473_p10) target bundleno = 876 (0x36c), region = 48  ;;  %s806_s27 = sshll.u32 (!%p1473_p10), %s1373_s0, 3 }
  0x6d   : > { %s308_s18 = scalar_lea.sflag (!%p1473_p10), [#allocation5], %s1373_s0  ;;  %s311_s20 = scalar_lea.vmem (!%p1473_p10), [#allocation4], %s806_s27 }
  0x71   : > { %1118 = dma.done.wait (%p1474_p0), %s308_s18, 128  }
  0x72   : > { %1120 = vsyncadd (%p1474_p0), %s308_s18, 4294967168  ;;  %s316_s11 = sand.u32 1, %s1230_s6   ;;  %s807_s21 = sshll.u32 %s1373_s0, 2 }
  0x73   : > { %s317_s17 = scalar_lea.sflag [#allocation8], %s316_s11  ;;  %s320_s19 = scalar_lea.vmem [#allocation7], %s807_s21 }
  0x74   : > { %1122 = dma.done.wait (%p1474_p0), %s317_s17, 64  }
  0x75   : > { %1124 = vsyncadd (%p1474_p0), %s317_s17, 4294967232  ;;  %p1475_p8 = scmp.eq.s32.totalorder %s1230_s6, 0 }
  0x77   : > { %1126 = dma.done.wait (%p1475_p8), [#allocation8], 512   ;;  %p1476_p11 = pmov %p1475_p8 }
  0x78   : > { %p1477_p2 = pmov %p1475_p8 }
  0x79   : > { %1128 = vsyncadd (%p1476_p11), [#allocation8], 4294966784 }
  0x7a   : > { %1130 = dma.done.wait (%p1477_p2), [#allocation11], 512   ;;  %p1478_p6 = pmov %p1477_p2 }
  0x7b   : > { %v1159_v2 = vmov 0.0   ;;  %vm1160_vm0 = vmmov 0   ;;  %v955_v3 = vld [vmem:[#allocation10 + $0x8] sm:$0xff]   ;;  %v957_v5 = vld [vmem:[#allocation10] sm:$0xff]   ;;  %v366_v7 = vld [vmem:[%s320_s19] sm:$0xf] }
  0x7c   : > { %1132 = vsyncadd (%p1478_p6), [#allocation11], 4294966784  ;;  %844 = vmatprep.subr.bf16.mxu0 %v1159_v2  ;;  %852 = vmatprep.subr.bf16.mxu1 %v1159_v2  ;;  %v956_v4 = vld [vmem:[#allocation9 + $0x8] sm:$0xff]   ;;  %v958_v6 = vld [vmem:[#allocation9] sm:$0xff]   ;;  %vm388_vm1 = vcmask 261120   ;;  %v1161_v43 = vmov 0  }
  0x7d   : > { %848 = vmatprep.mubr.msk.bf16.mxu0 %vm1160_vm0, %v1159_v2  ;;  %856 = vmatprep.mubr.msk.bf16.mxu1 %vm1160_vm0, %v1159_v2  ;;  %v365_v8 = vld [vmem:[%s311_s20] sm:$0xff]  ;;  %v959_v9 = vld [vmem:[#allocation10 + $0x18] sm:$0xff]   ;;  %v817_v16 = vld [vmem:[%s1455_s4] ss:$0 sm:$0xff]  ;;  %s829_s13 = sshll.u32 %s1230_s6, 7  ;;  %s363_s23 = scalar_lea.vmem [#allocation12], %s806_s27 }
  0x7e   : > { %845 = vmatpush3.bf16.msra.mxu0 %v955_v3  ;;  %853 = vmatpush3.bf16.msra.mxu1 %v956_v4  ;;  %v367_v10 = vpack.c.bf16 %v365_v8, %v365_v8  ;;  %v960_v11 = vld [vmem:[#allocation10 + $0x10] sm:$0xff]   ;;  %v961_v12 = vld [vmem:[#allocation9 + $0x18] sm:$0xff]   ;;  %v825_v33 = vld [vmem:[%s1455_s4 + $0x1] ss:$0 sm:$0xff]  ;;  %s684_s15 = sshll.u32 %s363_s23, 4  ;;  %s682_s18 = scalar_lea.hbm %s1457_s7, %s829_s13  ;;  %s685_s15 = int_to_ptr.vmem [resolvable:$true] %s684_s15 }
  0x7f   : > { %846 = vmatprep.subr.bf16.mxu0 %v1159_v2  ;;  %854 = vmatprep.subr.bf16.mxu1 %v1159_v2  ;;  %v962_v13 = vld [vmem:[#allocation9 + $0x10] sm:$0xff]   ;;  %v826_v42 = vld [vmem:[#allocation2] ss:$0 sm:$0xff]  ;;  %v827_v44 = vld [vmem:[#allocation3] ss:$0 sm:$0xff]  ;;  %s671_s20 = scalar_lea.sflag [#allocation6], %s1373_s0 }
  0x80   : > { %953 = vset.pattern.permute.xlu1 %v1161_v43  ;;  %954 = vset.pattern.permute.xlu0 %v1161_v43  ;;  %s1075_s11 = scalar_lea.vmem %s685_s15, 128  ;;  %p1479_p7 = scmp.ne.s32.totalorder %s1469_s8, 0 }
  0x81   : > { %654 = vperm.xlu1 %953, %v826_v42   ;;  %p1076_p12 = scmp.ne.s32.totalorder %s685_s15, %s1075_s11  ;;  %s1162_s6 = smov [#allocation12]  }
  0x82   : > { %847 = vmatpush3.bf16.msra.mxu0 %v957_v5  ;;  %855 = vmatpush3.bf16.msra.mxu1 %v958_v6  ;;  %s1079_s21 = sshll.u32 %s1162_s6, 4  ;;  %s1080_s21 = int_to_ptr.vmem [resolvable:$false] %s1079_s21 }
  0x83   : > { %860 = vmatprep.subr.bf16.mxu0 %v1159_v2  ;;  %868 = vmatprep.subr.bf16.mxu1 %v1159_v2  ;;  %p1077_p9 = pnand %p1076_p12, %p1479_p7  ;;  %s1081_s27 = scalar_lea.vmem %s1080_s21, 256 }
  0x84   : > { %p1082_p5 = scmp.lt.s32.totalorder %s685_s15, %s1080_s21  ;;  %p1083_p1 = scmp.lt.s32.totalorder %s1081_s27, %s1075_s11 }
  0x85   : > { %849 = vmatmul.mubr.msk.bf16.vlgmr.msra.gmra.mxu0 %vm388_vm1, %v366_v7  ;;  %857 = vmatmul.mubr.msk.bf16.vlgmr.msra.gmra.mxu1 %vm388_vm1, %v367_v10  ;;  %p1078_p13 = pneg %p1077_p9 }
  0x86   : > { %861 = vmatpush3.bf16.msra.mxu0 %v959_v9  ;;  %864 = vmatprep.mubr.msk.bf16.mxu0 %vm1160_vm0, %v1159_v2  ;;  %p1084_p4 = por %p1083_p1, %p1082_p5 }
  0x87   : > { %862 = vmatprep.subr.bf16.mxu0 %v1159_v2  ;;  %872 = vmatprep.mubr.msk.bf16.mxu1 %vm1160_vm0, %v1159_v2 }
  0x88   : > { %869 = vmatpush3.bf16.msra.mxu1 %v961_v12  ;;  %665 = vperm.xlu1 %953, %v827_v44   ;;  %p1085_p3 = pnand %p1084_p4, %p1078_p13 }
  0x89   : > { %870 = vmatprep.subr.bf16.mxu1 %v1159_v2 }
  0x8a   : > { %863 = vmatpush3.bf16.msra.mxu0 %v960_v11 }
  0x8c   : > { %871 = vmatpush3.bf16.msra.mxu1 %v962_v13 }
  0x8d   : > { %865 = vmatmul.mubr.msk.bf16.vlgmr.msra.gmra.mxu0 %vm388_vm1, %v366_v7 }
  0xfc   : > { %v655_v58 = vpop.permute.xlu1 %654 }
 0x103   : > { %v666_v62 = vpop.permute.xlu1 %665 }
 0x145   : > { %v426_v14 = vpop.f32.mrf.mxu0  ;;  %v481_v15 = vpop.f32.mrf.mxu1 }
 0x146   : > { %v482_v17 = vadd.f32 %v481_v15, %v426_v14 }
 0x147   : > { %v850_v18 = vpop.f32.mrf.mxu0  ;;  %v858_v19 = vpop.f32.mrf.mxu1 }
 0x148   : > { %v494_v20 = vadd.f32 %v817_v16, %v482_v17 }
 0x149   : > { %v429_v21 = vpop.f32.mrf.mxu0  ;;  %v484_v22 = vpop.f32.mrf.mxu1 }
 0x14a   : > { %v495_v23 = vmax.f32 %v494_v20, 0.0 }
 0x14b   : > { %v851_v24 = vpop.f32.mrf.mxu0  ;;  %v859_v25 = vpop.f32.mrf.mxu1 }
 0x14c   : > { %v496_v26 = vadd.f32 %v495_v23, %v365_v8 }
 0x14d   : > { %v554_v28 = vpop.f32.mrf.mxu0 }
 0x14e   : > { %v497_v27 = vpack.c.bf16 %v496_v26, %v496_v26 }
 0x14f   : > { %v866_v29 = vpop.f32.mrf.mxu0 }
 0x150   : > { %873 = vmatmul.mubr.msk.bf16.vlgmr.msra.gmra.mxu1 %vm388_vm1, %v497_v27 }
 0x151   : > { %v557_v30 = vpop.f32.mrf.mxu0 }
 0x153   : > { %v867_v31 = vpop.f32.mrf.mxu0 }
 0x210   : > { %v609_v32 = vpop.f32.mrf.mxu1 }
 0x211   : > { %v610_v34 = vadd.f32 %v609_v32, %v554_v28 }
 0x212   : > { %v874_v35 = vpop.f32.mrf.mxu1 }
 0x213   : > { %v623_v36 = vadd.f32 %v825_v33, %v610_v34 }
 0x214   : > { %v612_v37 = vpop.f32.mrf.mxu1 }
 0x215   : > { %v624_v38 = vmax.f32 %v623_v36, 0.0 }
 0x216   : > { %v875_v39 = vpop.f32.mrf.mxu1 }
 0x217   : > { %v625_v40 = vadd.f32 %v624_v38, %v496_v26 }
 0x219   : > { %v626_v41 = vsel %vm388_vm1, %v625_v40, 0.0 }
 0x21a   : > { %627 = vadd.xlane.f32.xlu0 %v626_v41 }
 0x2a3   : > { %v628_v45 = vpop.xlane.xlu0 %627 }
 0x2a4   : > { %v630_v46 = vmul.f32 0.03125, %v628_v45 }
 0x2a6   : > { %v631_v47 = vsub.f32 %v625_v40, %v630_v46 }
 0x2a8   : > { %v632_v48 = vmul.f32 %v631_v47, %v631_v47 }
 0x2aa   : > { %v633_v49 = vsel %vm388_vm1, %v632_v48, 0.0 }
 0x2ab   : > { %634 = vadd.xlane.f32.xlu0 %v633_v49 }
 0x334   : > { %v635_v50 = vpop.xlane.xlu0 %634 }
 0x335   : > { %v636_v51 = vmul.f32 0.032258064, %v635_v50 }
 0x337   : > { %963 = vrsqrt.f32 %v636_v51  ;;  %vm639_vm2 = vcmp.eq.f32.partialorder %v636_v51, inf  ;;  %v642_v54 = vand.u32 2147483648, %v636_v51  ;;  %vm641_vm3 = vcmp.eq.f32.partialorder %v636_v51, 0.0 }
 0x344   : > { %v964_v52 = vpop.eup %963 }
 0x345   : > { %v638_v53 = vmul.f32 %v964_v52, %v636_v51 }
 0x347   : > { %v640_v55 = vsel %vm639_vm2, %v636_v51, %v638_v53 }
 0x348   : > { %v643_v56 = vsel %vm641_vm3, %v642_v54, %v640_v55 }
 0x349   : > { %v644_v57 = vadd.f32 1e-05, %v643_v56 }
 0x34b   : > { %965 = vrcp.f32 %v644_v57 }
 0x358   : > { %v966_v59 = vpop.eup %965 }
 0x359   : > { %v646_v60 = vmul.f32 %v966_v59, %v631_v47 }
 0x35b   : > { %v657_v61 = vmul.f32 %v655_v58, %v646_v60 }
 0x35d   : > { %v668_v63 = vadd.f32 %v666_v62, %v657_v61 }
 0x35f   : > { %669 = vst.msk [vmem:[%s363_s23] sm:$0xff] %vm388_vm1, %v668_v63 }
 0x360   : > { %1088 = shalt.err (!%p1085_p3)
}
 0x361   : > { %s1089_s17 = scalar_lea.hbm %s682_s18, 128  ;;  %s1093_s9 = scalar_lea.hbm %s1457_s7, 256 }
 0x362   : > { %p1090_p10 = scmp.ne.s32.totalorder %s682_s18, %s1089_s17  ;;  %p1094_p11 = scmp.lt.s32.totalorder %s682_s18, %s1457_s7 }
 0x363   : > { %p1095_p2 = scmp.lt.s32.totalorder %s1093_s9, %s1089_s17 }
 0x364   : > { %p1091_p0 = pnand %p1090_p10, %p1479_p7 }
 0x365   : > { %p1096_p6 = por %p1095_p2, %p1094_p11 }
 0x366   : > { %p1092_p8 = pneg %p1091_p0 }
 0x368   : > { %p1097_p12 = pnand %p1096_p6, %p1092_p8 }
 0x36a   : > { %1100 = shalt.err (!%p1097_p12)
}
 0x36b   : > { %888 = dma.vmem_to_hbm [thread:$0]  (%p1479_p7), %s685_s15, 128, %s682_s18, %s671_s20  }
 0x36c PF: > { %s696_s26 = sand.u32 1, %s1139_s28   ;;  %p1480_p9 = scmp.ne.s32.totalorder %s1465_s10, 0 }
 0x36d   : > { %p1481_p13 = scmp.ge.s32.totalorder %s1151_s5, 2  ;;  %s697_s13 = scalar_lea.sflag [#allocation6], %s696_s26 }
 0x36f   : > { %p905_p5 = pnand %p1481_p13, %p1480_p9 }
 0x371   : > { %p906_p1 = pneg %p905_p5 }
 0x373   : > { %1134 = dma.done.wait (%p906_p1), %s697_s13, 128  }
 0x374   : > { %1136 = vsyncadd (%p906_p1), %s697_s13, 4294967168  ;;  %p28_p4 = scmp.ge.s32.totalorder %s1281_s25, 4   ;;  %s1482_s28 = smov %s1143_s29 }
 0x375   : > { %s1483_s29 = smov %s1147_s30  ;;  %s1484_s30 = smov %s1297_s12 }
 0x376   : > { %s1485_s5 = smov %s1281_s25  ;;  %30 = sbr.rel (!%p28_p4) target bundleno = 11 (0xb), region = 117 }
 0x37b   :  { %702 = vsyncpa [#allocation5], 1 }
 0x37c   :  { %704 = vsyncpa [#allocation5 + $0x1], 1 }
 0x37d   :  { %705 = vsyncpa [#allocation8], 1 }
 0x37e   :  { %707 = vsyncpa [#allocation8 + $0x1], 1 }
 0x37f   :  { %708 = vsyncpa [#allocation11], 1 }
 0x380   :  { %709 = vsyncpa [#allocation6], 1 }
 0x381   :  { %711 = vsyncpa [#allocation6 + $0x1], 1 }

</bundles_post_ra>
